<compile_context>
chip_gen: v5e
topology: v5e:2x2
jax: 0.10.0
libtpu: 0.0.40
codegen_flags: <defaults>
</compile_context>

<pallas_src>
import jax
import jax.numpy as jnp
from jax.experimental import pallas as pl
from jax.experimental.pallas import tpu as pltpu


def _round_up(a, m):
    return (a + m - 1) // m * m


def _largest_dividing_block(total, cap):
    """Largest multiple of 128 that divides `total` and is <= cap.

    `total` is always a multiple of 128, so 128 is a valid fallback.
    """
    t = (min(cap, total) // 128) * 128
    for cand in range(t, 127, -128):
        if total % cand == 0:
            return cand
    return 128


def _default_tiles():
    """Per-generation (tile_rows, tile_n, tile_k) sized to each chip's VMEM
    budget and HBM-roofline crossover."""
    kind = ""
    try:
        kind = jax.devices()[0].device_kind.lower()
    except Exception:
        pass
    if "v5" in kind:
        # ~8 MiB of double-buffered tiles: fits the 16 MiB scoped default.
        return 512, 512, 1024
    if "v7" in kind:
        # v7x: 64 MiB physical / 32 MiB scoped VMEM per TC -> moderate tiles.
        return 768, 768, 1024
    # v6e (and unknown): plenty of VMEM, go big; vmem_limit_bytes is raised.
    return 1024, 1024, 1024


def residual_linear_kernel(x_ref, w_ref, b_ref, r_ref, o_ref):
    # x_ref : (TM, TK) bf16   activation slab (MXU lhs)
    # w_ref : (TK, TN) bf16   weight block (MXU rhs)
    # b_ref : (1,  TN) f32    bias row
    # r_ref : (TM, TN) f32    residual (original x) tile
    # o_ref : (TM, TN) f32    output tile -- VMEM-resident across the K axis
    k = pl.program_id(2)
    partial = jnp.dot(x_ref[...], w_ref[...], preferred_element_type=jnp.float32)

    @pl.when(k == 0)
    def _():
        # Fuse bias + residual into the first K step; no separate epilogue.
        o_ref[...] = partial + b_ref[...] + r_ref[...]

    @pl.when(k != 0)
    def _():
        o_ref[...] += partial


def prepare_linear_params(w, b):
    """One-time parameter prep (hoisted out of the per-call path):
    pad Linear(H, H) weight/bias to a lane-aligned Hp and cast weight to bf16."""
    H = w.shape[0]
    Hp = _round_up(H, 128)
    wp = w if Hp == H else jnp.pad(w, ((0, Hp - H), (0, Hp - H)))
    bp = b if Hp == H else jnp.pad(b, (0, Hp - H))
    return wp.astype(jnp.bfloat16), bp.astype(jnp.float32).reshape(1, Hp)


def residual(x, w_bf16, b_row, *, tile_rows=None, tile_n=None, tile_k=None):
    """x: (B, S, H) float32. w_bf16: (Hp, Hp) bf16, b_row: (1, Hp) f32
    from prepare_linear_params. Returns fn(x) + x with fn = Linear(w, b)."""
    B, S, H = x.shape
    N = B * S
    Hp = w_bf16.shape[0]
    assert Hp % 128 == 0 and Hp >= H and w_bf16.shape == (Hp, Hp)
    assert b_row.shape == (1, Hp)

    d_rows, d_n, d_k = _default_tiles()
    tile_rows = tile_rows or d_rows
    tile_n = tile_n or d_n
    tile_k = tile_k or d_k

    # Output-col / reduction blocks: largest 128-multiples dividing Hp.
    TN = _largest_dividing_block(Hp, tile_n)
    TK = _largest_dividing_block(Hp, tile_k)

    # Row block: multiple of 8 sublanes, clamped to the (padded) row count.
    TM = min(_round_up(tile_rows, 8), _round_up(N, 8))
    Np = _round_up(N, TM)

    x2 = x.reshape(N, H)
    if Np == N and Hp == H:
        xp = x2
    else:
        xp = jnp.pad(x2, ((0, Np - N), (0, Hp - H)))
    x_bf16 = xp.astype(jnp.bfloat16)   # MXU lhs
    resid = xp                          # exact f32 residual path

    grid = (Np // TM, Hp // TN, Hp // TK)   # (rows, out-cols, K) -- K last

    # Double-buffered VMEM footprint of all blocks; used for vmem_limit_bytes.
    vmem_bytes = 2 * (TM * TK * 2 + TK * TN * 2 + TN * 4
                      + TM * TN * 4 + TM * TN * 4)
    vmem_limit = max(32 * 1024 * 1024, int(vmem_bytes * 3 // 2))

    cost = pl.CostEstimate(
        flops=2 * Np * Hp * Hp,
        transcendentals=0,
        bytes_accessed=(
            x_bf16.size * 2 * (Hp // TN)     # x re-streamed per out-col block
            + w_bf16.size * 2 * (Np // TM)   # w re-streamed per row block
            + b_row.size * 4 * (Np // TM)
            + resid.size * 4                 # residual: single pass
            + Np * Hp * 4                    # f32 output
        ),
    )

    out2 = pl.pallas_call(
        residual_linear_kernel,
        out_shape=jax.ShapeDtypeStruct((Np, Hp), jnp.float32),
        grid_spec=pltpu.PrefetchScalarGridSpec(
            num_scalar_prefetch=0,
            grid=grid,
            in_specs=[
                pl.BlockSpec((TM, TK), lambda i, j, k: (i, k)),  # x (bf16)
                pl.BlockSpec((TK, TN), lambda i, j, k: (k, j)),  # w (bf16)
                pl.BlockSpec((1, TN), lambda i, j, k: (0, j)),   # bias (f32)
                pl.BlockSpec((TM, TN), lambda i, j, k: (i, j)),  # residual (f32)
            ],
            out_specs=pl.BlockSpec((TM, TN), lambda i, j, k: (i, j)),
        ),
        compiler_params=pltpu.CompilerParams(
            dimension_semantics=("parallel", "parallel", "arbitrary"),
            vmem_limit_bytes=vmem_limit,
        ),
        cost_estimate=cost,
    )(x_bf16, w_bf16, b_row, resid)

    return out2[:N, :H].reshape(B, S, H)


if __name__ == "__main__":
    key = jax.random.PRNGKey(0)
    kx, kw, kb = jax.random.split(key, 3)

    # Small shapes implied by the module (Residual around a hidden-dim Linear).
    B, S, H = 2, 8, 32
    x = jax.random.normal(kx, (B, S, H), dtype=jnp.float32)
    w = jax.random.normal(kw, (H, H), dtype=jnp.float32) * 0.02
    b = jax.random.normal(kb, (H,), dtype=jnp.float32) * 0.02

    w_bf16, b_row = prepare_linear_params(w, b)
    out = residual(x, w_bf16, b_row)
    out = jax.block_until_ready(out)

    # Pure-JAX reference of Residual semantics: fn(x) + x.
    ref = jnp.einsum("bsh,hk->bsk", x, w) + b + x
    assert out.shape == x.shape
    # bf16 matmul inputs (f32 accumulation) -> slightly looser tolerance.
    assert jnp.allclose(out, ref, atol=2e-2, rtol=2e-2)

    # Second check: exercise K-axis accumulation, multi-block grid and
    # row/col padding with explicit small tiles.
    kx2, kw2, kb2 = jax.random.split(jax.random.PRNGKey(1), 3)
    B2, S2, H2 = 1, 100, 200
    x2 = jax.random.normal(kx2, (B2, S2, H2), dtype=jnp.float32)
    w2 = jax.random.normal(kw2, (H2, H2), dtype=jnp.float32) * 0.02
    b2 = jax.random.normal(kb2, (H2,), dtype=jnp.float32) * 0.02
    w2_bf16, b2_row = prepare_linear_params(w2, b2)
    out2 = residual(x2, w2_bf16, b2_row, tile_rows=64, tile_n=128, tile_k=128)
    out2 = jax.block_until_ready(out2)
    ref2 = jnp.einsum("bsh,hk->bsk", x2, w2) + b2 + x2
    assert out2.shape == x2.shape
    assert jnp.allclose(out2, ref2, atol=2e-2, rtol=2e-2)

    print("KERNEL_OK")
</pallas_src>

<mosaic_0001>
module attributes {stable_mosaic.version = 11 : i64} {
  func.func @residual_linear_kernel(%arg0: i32, %arg1: i32, %arg2: i32, %arg3: memref<16x128xbf16, #tpu.memory_space<vmem>>, %arg4: memref<128x128xbf16, #tpu.memory_space<vmem>>, %arg5: memref<1x128xf32, #tpu.memory_space<vmem>>, %arg6: memref<16x128xf32, #tpu.memory_space<vmem>>, %arg7: memref<16x128xf32, #tpu.memory_space<vmem>>) attributes {dimension_semantics = [#tpu.dimension_semantics<parallel>, #tpu.dimension_semantics<parallel>, #tpu.dimension_semantics<arbitrary>], iteration_bounds = array<i64: 1, 1, 1>, scalar_prefetch = 0 : i64, scratch_operands = 0 : i64, tpu.core_type = #tpu.core_type<tc>, window_params = [{transform_indices = @transform_0, window_bounds = array<i64: 16, 128>}, {transform_indices = @transform_1, window_bounds = array<i64: 128, 128>}, {transform_indices = @transform_2, window_bounds = array<i64: 1, 128>}, {transform_indices = @transform_3, window_bounds = array<i64: 16, 128>}, {transform_indices = @transform_4, window_bounds = array<i64: 16, 128>}]} {
    %c0 = arith.constant 0 : index
    %c0_0 = arith.constant 0 : index
    %0 = vector.load %arg3[%c0, %c0_0] : memref<16x128xbf16, #tpu.memory_space<vmem>>, vector<16x128xbf16>
    %c0_1 = arith.constant 0 : index
    %c0_2 = arith.constant 0 : index
    %1 = vector.load %arg4[%c0_1, %c0_2] : memref<128x128xbf16, #tpu.memory_space<vmem>>, vector<128x128xbf16>
    %cst = arith.constant dense<0.000000e+00> : vector<16x128xf32>
    %2 = tpu.matmul %0, %1, %cst {dimension_numbers = #tpu.dot_dimension_numbers<[1], [0], [0], [1], [0, 0, 1, 1], [], []>} : vector<16x128xbf16>, vector<128x128xbf16>, vector<16x128xf32> -> vector<16x128xf32>
    %c0_i32 = arith.constant 0 : i32
    %3 = arith.cmpi eq, %arg2, %c0_i32 : i32
    %4 = arith.extui %3 : i1 to i32
    %c0_i32_3 = arith.constant 0 : i32
    %5 = arith.cmpi ne, %4, %c0_i32_3 : i32
    scf.if %5 {
      %c0_6 = arith.constant 0 : index
      %c0_7 = arith.constant 0 : index
      %9 = vector.load %arg5[%c0_6, %c0_7] : memref<1x128xf32, #tpu.memory_space<vmem>>, vector<1x128xf32>
      %10 = vector.broadcast %9 : vector<1x128xf32> to vector<16x128xf32>
      %11 = arith.addf %2, %10 : vector<16x128xf32>
      %c0_8 = arith.constant 0 : index
      %c0_9 = arith.constant 0 : index
      %12 = vector.load %arg6[%c0_8, %c0_9] : memref<16x128xf32, #tpu.memory_space<vmem>>, vector<16x128xf32>
      %13 = arith.addf %11, %12 : vector<16x128xf32>
      %c0_10 = arith.constant 0 : index
      %c0_11 = arith.constant 0 : index
      %14 = vector.load %arg7[%c0_10, %c0_11] : memref<16x128xf32, #tpu.memory_space<vmem>>, vector<16x128xf32>
      tpu.vector_store %arg7[%c0_10, %c0_11], %13 {strides = array<i32>} : memref<16x128xf32, #tpu.memory_space<vmem>>, vector<16x128xf32>,
    } else {
    }
    %c0_i32_4 = arith.constant 0 : i32
    %6 = arith.cmpi ne, %arg2, %c0_i32_4 : i32
    %7 = arith.extui %6 : i1 to i32
    %c0_i32_5 = arith.constant 0 : i32
    %8 = arith.cmpi ne, %7, %c0_i32_5 : i32
    scf.if %8 {
      %c0_6 = arith.constant 0 : index
      %c0_7 = arith.constant 0 : index
      %9 = vector.load %arg7[%c0_6, %c0_7] : memref<16x128xf32, #tpu.memory_space<vmem>>, vector<16x128xf32>
      %10 = arith.addf %9, %2 : vector<16x128xf32>
      %c0_8 = arith.constant 0 : index
      %c0_9 = arith.constant 0 : index
      %11 = vector.load %arg7[%c0_8, %c0_9] : memref<16x128xf32, #tpu.memory_space<vmem>>, vector<16x128xf32>
      tpu.vector_store %arg7[%c0_8, %c0_9], %10 {strides = array<i32>} : memref<16x128xf32, #tpu.memory_space<vmem>>, vector<16x128xf32>,
    } else {
    }
    return
  }
  func.func @transform_0(%arg0: i32, %arg1: i32, %arg2: i32) -> (i32, i32) {
    %c0_i32 = arith.constant 0 : i32
    return %arg0, %arg2 : i32, i32
  }
  func.func @transform_1(%arg0: i32, %arg1: i32, %arg2: i32) -> (i32, i32) {
    %c0_i32 = arith.constant 0 : i32
    return %arg2, %arg1 : i32, i32
  }
  func.func @transform_2(%arg0: i32, %arg1: i32, %arg2: i32) -> (i32, i32) {
    %c0_i32 = arith.constant 0 : i32
    %c0_i32_0 = arith.constant 0 : i32
    return %c0_i32, %arg1 : i32, i32
  }
  func.func @transform_3(%arg0: i32, %arg1: i32, %arg2: i32) -> (i32, i32) {
    %c0_i32 = arith.constant 0 : i32
    return %arg0, %arg1 : i32, i32
  }
  func.func @transform_4(%arg0: i32, %arg1: i32, %arg2: i32) -> (i32, i32) {
    %c0_i32 = arith.constant 0 : i32
    return %arg0, %arg1 : i32, i32
  }
}

</mosaic_0001>

<bundles_post_ra>
// kernel: tpu_custom_call.1
= control target key start
LH: loop header
LB: loop body
LE: loop exit
PB: predicated region body
PF: predicated region fallthrough
CT: control target
= control target key end

     0   :  { %9 = vsyncpa [#allocation3], 0  ;;  %s407_s0 = inlined_call_operand.hbm [shape: bf16[16,128], index: 0, kind: input, shape index: {}]   ;;  %s408_s1 = inlined_call_operand.hbm [shape: bf16[128,128], index: 1, kind: input, shape index: {}]   ;;  %s409_s2 = inlined_call_operand.vmem [shape: f32[1,128], index: 2, kind: input, shape index: {}]   ;;  %s410_s3 = inlined_call_operand.hbm [shape: f32[16,128], index: 3, kind: input, shape index: {}]   ;;  %s411_s4 = inlined_call_operand.hbm [shape: f32[16,128], index: 4, kind: output, shape index: {}]  }
   0x1   :  { %10 = vsyncpa [#allocation6], 0 }
   0x2   :  { %11 = vsyncpa [#allocation4], 0  ;;  %s29_s17 = sshll.u32 %s408_s1, 4  ;;  %s353_s18 = smov [#allocation5]   ;;  %s30_s17 = int_to_ptr.hbm [resolvable:$true] %s29_s17 }
   0x3   :  { %s31_s19 = sshll.u32 %s353_s18, 4  ;;  %s16_s22 = sshll.u32 %s407_s0, 4  ;;  %s32_s19 = int_to_ptr.vmem [resolvable:$true] %s31_s19  ;;  %s17_s22 = int_to_ptr.hbm [resolvable:$true] %s16_s22 }
   0x4   :  { %s354_s23 = smov 64   ;;  %s355_s24 = smov 4  }
   0x5   :  { %37 = dma.hbm_to_vmem [thread:$0]  %s30_s17, 1024, %s32_s19, [#allocation6], %s354_s23, %s354_s23, %s355_s24  }
   0x6   :  { %s356_s25 = smov [#allocation2]   ;;  %s44_s29 = sshll.u32 %s410_s3, 4  ;;  %s45_s29 = int_to_ptr.hbm [resolvable:$true] %s44_s29 }
   0x7   :  { %s18_s26 = sshll.u32 %s356_s25, 4  ;;  %s357_s1 = smov [#allocation7]   ;;  %s19_s26 = int_to_ptr.vmem [resolvable:$true] %s18_s26 }
   0x8   :  { %24 = dma.hbm_to_vmem [thread:$0]  %s17_s22, 128, %s19_s26, [#allocation3], %s354_s23, %s354_s23, %s355_s24  }
   0x9   :  { %s46_s30 = sshll.u32 %s357_s1, 4  ;;  %s358_s5 = smov 128   ;;  %s47_s30 = int_to_ptr.vmem [resolvable:$true] %s46_s30 }
   0xa   :  { %s359_s6 = smov 8  }
   0xb   :  { %52 = dma.hbm_to_vmem [thread:$0]  %s45_s29, 256, %s47_s30, [#allocation6], %s358_s5, %s358_s5, %s359_s6  }
   0xc   :  { %347 = dma.done.wait [#allocation3], 128  }
   0xd   :  { %348 = vsyncadd [#allocation3], 4294967168 }
   0xe   :  { %349 = dma.done.wait [#allocation6], 1280  }
   0xf   :  { %350 = vsyncadd [#allocation6], 4294966016  ;;  %v241_v0 = vld [vmem:[#allocation5 + $0x38] sm:$0xff]  ;;  %v240_v1 = vld [vmem:[#allocation5 + $0x30] sm:$0xff]  ;;  %s360_s7 = smov [#allocation8]   ;;  %s183_s11 = sshll.u32 %s411_s4, 4  ;;  %s184_s11 = int_to_ptr.hbm [resolvable:$true] %s183_s11 }
  0x10   :  { %137 = vmatpush.bf16.msra.mxu0 %v241_v0  ;;  %v239_v2 = vld [vmem:[#allocation5 + $0x28] sm:$0xff]  ;;  %v238_v3 = vld [vmem:[#allocation5 + $0x20] sm:$0xff]  ;;  %v237_v4 = vld [vmem:[#allocation5 + $0x18] sm:$0xff]  ;;  %s181_s8 = sshll.u32 %s360_s7, 4  ;;  %s182_s8 = int_to_ptr.vmem [resolvable:$true] %s181_s8 }
  0x11   :  { %v236_v5 = vld [vmem:[#allocation5 + $0x10] sm:$0xff]  ;;  %v235_v6 = vld [vmem:[#allocation5 + $0x8] sm:$0xff]  ;;  %v234_v7 = vld [vmem:[#allocation5] sm:$0xff] }
  0x12   :  { %v233_v8 = vld [vmem:[#allocation2] sm:$0xff]  ;;  %v161_v11 = vld [vmem:[#allocation7] sm:$0xff]  ;;  %v162_v15 = vld [vmem:[#allocation7 + $0x8] sm:$0xff] }
  0x13   :  { %v250_v9 = vld [vmem:[%s409_s2] ss:$0 sm:$0xff] }
  0x14   :  { %138 = vmatpush.bf16.msra.mxu0 %v240_v1 }
  0x18   :  { %139 = vmatpush.bf16.msra.mxu0 %v239_v2 }
  0x1c   :  { %140 = vmatpush.bf16.msra.mxu0 %v238_v3 }
  0x20   :  { %141 = vmatpush.bf16.msra.mxu0 %v237_v4 }
  0x24   :  { %142 = vmatpush.bf16.msra.mxu0 %v236_v5 }
  0x28   :  { %143 = vmatpush.bf16.msra.mxu0 %v235_v6 }
  0x2c   :  { %144 = vmatpush.bf16.msra.mxu0 %v234_v7 }
  0x2f   :  { %145 = vmatmul.bf16.vlgmr.msra.gmra.mxu0 %v233_v8 }
  0xac   :  { %v146_v10 = vpop.f32.mrf.mxu0 }
  0xad   :  { %v159_v12 = vadd.f32 %v250_v9, %v146_v10 }
  0xaf   :  { %v163_v13 = vadd.f32 %v161_v11, %v159_v12 }
  0xb1   :  { %165 = vst [vmem:[#allocation8] sm:$0xff] %v163_v13 }
  0xb4   :  { %v148_v14 = vpop.f32.mrf.mxu0 }
  0xb5   :  { %v160_v16 = vadd.f32 %v250_v9, %v148_v14 }
  0xb7   :  { %v164_v17 = vadd.f32 %v162_v15, %v160_v16 }
  0xb9   :  { %166 = vst [vmem:[#allocation8 + $0x8] sm:$0xff] %v164_v17 }
  0xba   :  { %189 = dma.vmem_to_hbm [thread:$0]  %s182_s8, 256, %s184_s11, [#allocation4], %s358_s5, %s358_s5, %s359_s6  }
  0xbb   :  { %351 = dma.done.wait [#allocation4], 256  }
  0xbc   :  { %352 = vsyncadd [#allocation4], 4294967040 }
  0xbd   :  { %194 = vsyncpa [#allocation3], 1 }
  0xbe   :  { %195 = vsyncpa [#allocation6], 1 }
  0xbf   :  { %196 = vsyncpa [#allocation4], 1 }

</bundles_post_ra>
